<compile_context>
chip_gen: v6e
topology: v6e:2x2x1
jax: 0.10.0
libtpu: 0.0.40
codegen_flags: <defaults>
</compile_context>

<pallas_src>
import jax
import jax.numpy as jnp
from jax.experimental import pallas as pl
from jax.experimental.pallas import tpu as pltpu


def _round_up(x, m):
    return (x + m - 1) // m * m


def _gcn_fused_kernel(adj_ref, x_ref, w_ref, out_ref, acc_ref):
    """acc[i] += adj[i,k] @ (x[k] @ W);   out[i] = acc[i] at the last k."""
    k = pl.program_id(1)

    @pl.when(k == 0)
    def _():
        acc_ref[...] = jnp.zeros_like(acc_ref)

    # Support tile for this k-block, recomputed per row block (free under the
    # adj DMA bound).  bf16 MXU operands, f32 accumulation.
    support = jnp.dot(
        x_ref[...].astype(jnp.bfloat16),
        w_ref[...],
        preferred_element_type=jnp.float32,
    ).astype(jnp.bfloat16)

    acc_ref[...] += jnp.dot(
        adj_ref[...].astype(jnp.bfloat16),
        support,
        preferred_element_type=jnp.float32,
    )

    @pl.when(k == pl.num_programs(1) - 1)
    def _():
        out_ref[...] = acc_ref[...].astype(out_ref.dtype)


def graph_convolution(x, weight, adj, *, tm=512, tk=512):
    """output = adj @ (x @ weight), fused tiled Pallas TPU implementation."""
    n, in_f = x.shape
    in_f_w, out_f = weight.shape
    assert in_f == in_f_w
    assert adj.shape == (n, n)
    out_dtype = x.dtype

    # Tile sizes: multiples of 128, clamped to the (padded) problem size.
    tm = max(128, min(tm, _round_up(n, 128)))
    tk = max(128, min(tk, _round_up(n, 128)))

    out_fp = _round_up(out_f, 128)  # lane-dense output width

    # Weight: pad columns to lane width, cast to bf16 (tiny, one-off).
    # TODO(synk): tile over out_fp / in_f for very wide layers instead of
    #   keeping the full weight block resident in VMEM.
    w_p = jnp.pad(weight, ((0, 0), (0, out_fp - out_f))).astype(jnp.bfloat16)

    if n % tm == 0 and n % tk == 0:
        # Fast path: stream adj / x in native dtype, cast in-kernel. No copy.
        adj_p, x_p = adj, x
        n_rows_pad = n_cols_pad = n
    else:
        # Ragged path: pad each axis independently (rows->tm, cols->tk);
        # pre-cast adj to bf16 so the unavoidable padded copy (and the kernel
        # stream) is half-width.
        n_rows_pad = _round_up(n, tm)
        n_cols_pad = _round_up(n, tk)
        adj_p = jnp.pad(
            adj, ((0, n_rows_pad - n), (0, n_cols_pad - n))
        ).astype(jnp.bfloat16)
        x_p = jnp.pad(x, ((0, n_cols_pad - n), (0, 0)))

    grid = (n_rows_pad // tm, n_cols_pad // tk)  # reduction axis (k) last

    # VMEM budget: double-buffered adj / x / out tiles + resident W + f32 acc.
    out_itemsize = jnp.dtype(out_dtype).itemsize
    tile_bytes = (
        2 * tm * tk * adj_p.dtype.itemsize       # adj tiles, double-buffered
        + 2 * tk * in_f * x_p.dtype.itemsize     # x tiles, double-buffered
        + in_f * out_fp * 2                      # resident bf16 weight
        + 2 * tm * out_fp * out_itemsize         # output tiles, double-buffered
        + tm * out_fp * 4                        # resident f32 accumulator
    )
    try:
        vmem_cap = int(pltpu.get_tpu_info().vmem_capacity_bytes)
    except Exception:
        vmem_cap = 64 * 1024 * 1024  # conservative: v7x per-TensorCore VMEM
    vmem_limit = int(
        min(max(2 * tile_bytes, 16 * 1024 * 1024), int(0.45 * vmem_cap))
    )

    flops = (
        2 * n_rows_pad * n_cols_pad * out_fp            # adj @ support
        + 2 * grid[0] * n_cols_pad * in_f * out_fp      # support recompute
    )
    bytes_accessed = (
        n_rows_pad * n_cols_pad * adj_p.dtype.itemsize
        + grid[0] * n_cols_pad * in_f * x_p.dtype.itemsize
        + in_f * out_fp * 2
        + n_rows_pad * out_fp * out_itemsize
    )

    out_p = pl.pallas_call(
        _gcn_fused_kernel,
        out_shape=jax.ShapeDtypeStruct((n_rows_pad, out_fp), out_dtype),
        grid_spec=pltpu.PrefetchScalarGridSpec(
            num_scalar_prefetch=0,
            grid=grid,
            in_specs=[
                pl.BlockSpec((tm, tk), lambda i, k: (i, k)),        # adj tile
                pl.BlockSpec((tk, in_f), lambda i, k: (k, 0)),      # x tile
                pl.BlockSpec((in_f, out_fp), lambda i, k: (0, 0)),  # W resident
            ],
            out_specs=pl.BlockSpec((tm, out_fp), lambda i, k: (i, 0)),
            scratch_shapes=[pltpu.VMEM((tm, out_fp), jnp.float32)],
        ),
        compiler_params=pltpu.CompilerParams(
            dimension_semantics=("parallel", "arbitrary"),
            vmem_limit_bytes=vmem_limit,
        ),
        cost_estimate=pl.CostEstimate(
            flops=int(flops), transcendentals=0,
            bytes_accessed=int(bytes_accessed),
        ),
    )(adj_p, x_p, w_p)

    return out_p[:n, :out_f]


if __name__ == "__main__":
    # Small, deterministic problem: N nodes, in_features -> out_features.
    N = 512
    IN_FEATURES = 64
    OUT_FEATURES = 32

    key = jax.random.PRNGKey(0)
    k_x, k_w, k_a = jax.random.split(key, 3)

    # Node features.
    x = jax.random.normal(k_x, (N, IN_FEATURES), dtype=jnp.float32)

    # Weight init matching reset_parameters(): uniform(-stdv, stdv),
    # stdv = 1 / sqrt(out_features).
    stdv = 1.0 / jnp.sqrt(jnp.float32(OUT_FEATURES))
    weight = jax.random.uniform(
        k_w, (IN_FEATURES, OUT_FEATURES), dtype=jnp.float32,
        minval=-stdv, maxval=stdv,
    )

    # Dense symmetric-normalized adjacency with self-loops (typical GCN adj).
    a = (jax.random.uniform(k_a, (N, N), dtype=jnp.float32) > 0.9).astype(jnp.float32)
    a = jnp.maximum(a, a.T) + jnp.eye(N, dtype=jnp.float32)
    deg = jnp.sum(a, axis=1)
    d_inv_sqrt = 1.0 / jnp.sqrt(deg)
    adj = a * d_inv_sqrt[:, None] * d_inv_sqrt[None, :]

    # tm=tk=256 -> grid (2, 2): exercises k-accumulation, init/writeback, and
    # the megacore row split, while keeping tiles a sensible size.
    out = graph_convolution(x, weight, adj, tm=256, tk=256)
    out = jax.block_until_ready(out)
    assert out.shape == (N, OUT_FEATURES)

    # Reference 1: identical bf16-quantized operands with f32 accumulation
    # -> matches the kernel up to accumulation order.
    x_bf = x.astype(jnp.bfloat16).astype(jnp.float32)
    w_bf = weight.astype(jnp.bfloat16).astype(jnp.float32)
    adj_bf = adj.astype(jnp.bfloat16).astype(jnp.float32)
    support_bf = (x_bf @ w_bf).astype(jnp.bfloat16).astype(jnp.float32)
    ref_bf16 = adj_bf @ support_bf
    assert jnp.allclose(out, ref_bf16, atol=2e-3, rtol=2e-3)

    # Reference 2: full-precision torch semantics (adj @ (x @ weight)),
    # loose tolerance to cover the bf16 operand quantization.
    ref_f32 = adj @ (x @ weight)
    assert jnp.allclose(out, ref_f32, atol=5e-2, rtol=5e-2)

    # Ragged-N path (per-axis padding branch): N not a multiple of the tiles.
    n2 = 200
    out2 = graph_convolution(x[:n2], weight, adj[:n2, :n2])
    out2 = jax.block_until_ready(out2)
    ref2 = adj[:n2, :n2] @ (x[:n2] @ weight)
    assert out2.shape == (n2, OUT_FEATURES)
    assert jnp.allclose(out2, ref2, atol=5e-2, rtol=5e-2)

    print("KERNEL_OK")
</pallas_src>

<mosaic_0001>
module attributes {stable_mosaic.version = 11 : i64} {
  func.func @_gcn_fused_kernel(%arg0: i32, %arg1: i32, %arg2: memref<256x256xf32, #tpu.memory_space<vmem>>, %arg3: memref<256x64xf32, #tpu.memory_space<vmem>>, %arg4: memref<64x128xbf16, #tpu.memory_space<vmem>>, %arg5: memref<256x128xf32, #tpu.memory_space<vmem>>, %arg6: memref<256x128xf32, #tpu.memory_space<vmem>>) attributes {dimension_semantics = [#tpu.dimension_semantics<parallel>, #tpu.dimension_semantics<arbitrary>], iteration_bounds = array<i64: 2, 2>, scalar_prefetch = 0 : i64, scratch_operands = 1 : i64, tpu.core_type = #tpu.core_type<tc>, window_params = [{transform_indices = @transform_0, window_bounds = array<i64: 256, 256>}, {transform_indices = @transform_1, window_bounds = array<i64: 256, 64>}, {pipeline_mode = #tpu.pipeline_mode<synchronous>, transform_indices = @transform_2, window_bounds = array<i64: 64, 128>}, {transform_indices = @transform_3, window_bounds = array<i64: 256, 128>}]} {
    %c0_i32 = arith.constant 0 : i32
    %0 = arith.cmpi eq, %arg1, %c0_i32 : i32
    %1 = arith.extui %0 : i1 to i32
    %c0_i32_0 = arith.constant 0 : i32
    %2 = arith.cmpi ne, %1, %c0_i32_0 : i32
    scf.if %2 {
      %cst_12 = arith.constant 0.000000e+00 : f32
      %17 = vector.broadcast %cst_12 : f32 to vector<256x128xf32>
      %c0_13 = arith.constant 0 : index
      %c0_14 = arith.constant 0 : index
      %18 = vector.load %arg6[%c0_13, %c0_14] : memref<256x128xf32, #tpu.memory_space<vmem>>, vector<256x128xf32>
      tpu.vector_store %arg6[%c0_13, %c0_14], %17 {strides = array<i32>} : memref<256x128xf32, #tpu.memory_space<vmem>>, vector<256x128xf32>,
    } else {
    }
    %c0 = arith.constant 0 : index
    %c0_1 = arith.constant 0 : index
    %3 = vector.load %arg3[%c0, %c0_1] : memref<256x64xf32, #tpu.memory_space<vmem>>, vector<256x64xf32>
    %4 = arith.truncf %3 : vector<256x64xf32> to vector<256x64xbf16>
    %c0_2 = arith.constant 0 : index
    %c0_3 = arith.constant 0 : index
    %5 = vector.load %arg4[%c0_2, %c0_3] : memref<64x128xbf16, #tpu.memory_space<vmem>>, vector<64x128xbf16>
    %cst = arith.constant dense<0.000000e+00> : vector<256x128xf32>
    %6 = tpu.matmul %4, %5, %cst {dimension_numbers = #tpu.dot_dimension_numbers<[1], [0], [0], [1], [0, 0, 1, 1], [], []>} : vector<256x64xbf16>, vector<64x128xbf16>, vector<256x128xf32> -> vector<256x128xf32>
    %7 = arith.truncf %6 : vector<256x128xf32> to vector<256x128xbf16>
    %c0_4 = arith.constant 0 : index
    %c0_5 = arith.constant 0 : index
    %8 = vector.load %arg6[%c0_4, %c0_5] : memref<256x128xf32, #tpu.memory_space<vmem>>, vector<256x128xf32>
    %c0_6 = arith.constant 0 : index
    %c0_7 = arith.constant 0 : index
    %9 = vector.load %arg2[%c0_6, %c0_7] : memref<256x256xf32, #tpu.memory_space<vmem>>, vector<256x256xf32>
    %10 = arith.truncf %9 : vector<256x256xf32> to vector<256x256xbf16>
    %cst_8 = arith.constant dense<0.000000e+00> : vector<256x128xf32>
    %11 = tpu.matmul %10, %7, %cst_8 {dimension_numbers = #tpu.dot_dimension_numbers<[1], [0], [0], [1], [0, 0, 1, 1], [], []>} : vector<256x256xbf16>, vector<256x128xbf16>, vector<256x128xf32> -> vector<256x128xf32>
    %12 = arith.addf %8, %11 : vector<256x128xf32>
    %c0_9 = arith.constant 0 : index
    %c0_10 = arith.constant 0 : index
    %13 = vector.load %arg6[%c0_9, %c0_10] : memref<256x128xf32, #tpu.memory_space<vmem>>, vector<256x128xf32>
    tpu.vector_store %arg6[%c0_9, %c0_10], %12 {strides = array<i32>} : memref<256x128xf32, #tpu.memory_space<vmem>>, vector<256x128xf32>,
    %c1_i32 = arith.constant 1 : i32
    %14 = arith.cmpi eq, %arg1, %c1_i32 : i32
    %15 = arith.extui %14 : i1 to i32
    %c0_i32_11 = arith.constant 0 : i32
    %16 = arith.cmpi ne, %15, %c0_i32_11 : i32
    scf.if %16 {
      %c0_12 = arith.constant 0 : index
      %c0_13 = arith.constant 0 : index
      %17 = vector.load %arg6[%c0_12, %c0_13] : memref<256x128xf32, #tpu.memory_space<vmem>>, vector<256x128xf32>
      %c0_14 = arith.constant 0 : index
      %c0_15 = arith.constant 0 : index
      %18 = vector.load %arg5[%c0_14, %c0_15] : memref<256x128xf32, #tpu.memory_space<vmem>>, vector<256x128xf32>
      tpu.vector_store %arg5[%c0_14, %c0_15], %17 {strides = array<i32>} : memref<256x128xf32, #tpu.memory_space<vmem>>, vector<256x128xf32>,
    } else {
    }
    return
  }
  func.func @transform_0(%arg0: i32, %arg1: i32) -> (i32, i32) {
    %c0_i32 = arith.constant 0 : i32
    return %arg0, %arg1 : i32, i32
  }
  func.func @transform_1(%arg0: i32, %arg1: i32) -> (i32, i32) {
    %c0_i32 = arith.constant 0 : i32
    %c0_i32_0 = arith.constant 0 : i32
    return %arg1, %c0_i32 : i32, i32
  }
  func.func @transform_2(%arg0: i32, %arg1: i32) -> (i32, i32) {
    %c0_i32 = arith.constant 0 : i32
    %c0_i32_0 = arith.constant 0 : i32
    %c0_i32_1 = arith.constant 0 : i32
    return %c0_i32, %c0_i32_0 : i32, i32
  }
  func.func @transform_3(%arg0: i32, %arg1: i32) -> (i32, i32) {
    %c0_i32 = arith.constant 0 : i32
    %c0_i32_0 = arith.constant 0 : i32
    return %arg0, %c0_i32 : i32, i32
  }
}

</mosaic_0001>

<bundles_post_ra>
// kernel: tpu_custom_call.1
= control target key start
LH: loop header
LB: loop body
LE: loop exit
PB: predicated region body
PF: predicated region fallthrough
CT: control target
= control target key end

     0   :  { %8 = vsyncpa [#allocation4], 0  ;;  %s2003_s0 = inlined_call_operand.hbm [shape: f32[512,512], index: 0, kind: input, shape index: {}]   ;;  %s2004_s1 = inlined_call_operand.vmem [shape: f32[512,64], index: 1, kind: input, shape index: {}]   ;;  %s2005_s2 = inlined_call_operand.vmem [shape: bf16[64,128], index: 2, kind: input, shape index: {}]   ;;  %s2006_s3 = inlined_call_operand.hbm [shape: f32[512,128], index: 3, kind: output, shape index: {}]  }
   0x1   :  { %10 = vsyncpa [#allocation4 + $0x1], 0 }
   0x2   :  { %11 = vsyncpa [#allocation5], 0 }
   0x3   :  { %13 = vsyncpa [#allocation5 + $0x1], 0  ;;  %s1629_s12 = smov 0   ;;  %s1631_s13 = smov 0  }
   0x4   :  { %s1633_s14 = smov 0   ;;  %s1635_s15 = smov 0  }
   0x5   :  { %s1637_s16 = smov 0   ;;  %s1639_s17 = smov 0  }
   0x6   :  { %s1641_s18 = smov 0   ;;  %s1643_s19 = smov 0  }
   0x7   :  { %s1645_s20 = smov 0   ;;  %s1647_s21 = smov 0  }
   0x8   :  { %s1649_s22 = smov 0  }
   0x9 LB: > { %2011 = sst [smem:[#allocation9_spill]] %s1579_s17  ;;  %s1108_s23 = sadd.s32 4294967295, %s1599_s22   ;;  %s1599_s22 = sphi %s1649_s22, %s19_s22   ;;  %s1595_s21 = sphi %s1647_s21, %s2025_s21   ;;  %s1591_s20 = sphi %s1645_s20, %s2032_s20   ;;  %s1587_s19 = sphi %s1643_s19, %s2023_s19   ;;  %s1583_s18 = sphi %s1641_s18, %s2031_s18   ;;  %s1579_s17 = sphi %s1639_s17, %s2022_s17   ;;  %s1575_s16 = sphi %s1637_s16, %s2030_s16   ;;  %s1571_s15 = sphi %s1635_s15, %s2029_s15   ;;  %s1567_s14 = sphi %s1633_s14, %s2028_s14   ;;  %s1563_s13 = sphi %s1631_s13, %s2027_s13   ;;  %s1559_s12 = sphi %s1629_s12, %s2026_s12  }
   0xa   : > { %2012 = sst [smem:[#allocation10_spill]] %s1595_s21  ;;  %s1109_s24 = sadd.s32 4294967294, %s1599_s22  }
   0xb   : > { %s28_s25 = sadd.s32 1, %s1591_s20  ;;  %s31_s26 = sadd.s32 1, %s1595_s21 }
   0xc   : > { %p29_p0 = scmp.ge.s32.totalorder %s28_s25, 2  ;;  %s40_s27 = sadd.s32 1, %s1579_s17 }
   0xd   : > { %p47_p1 = scmp.ne.s32.totalorder %s1579_s17, %s1575_s16  ;;  %p48_p2 = scmp.eq.s32.totalorder %s1599_s22, 0 }
   0xe   : > { %s2034_s25 = smov (%p29_p0, %s28_s25), 0  ;;  %s2036_s26 = smov (!%p29_p0, %s31_s26), %s1595_s21 }
   0xf   : > { %2013 = sst [smem:[#allocation11_spill]] %s2034_s25  ;;  %s36_s28 = ssub.s32 %s1591_s20, %s2034_s25 }
  0x10   : > { %p1695_p3 = por %p48_p2, %p47_p1  ;;  %p33_p4 = scmp.ge.s32.totalorder %s2036_s26, 2 }
  0x11   : > { %p53_p5 = scmp.ne.s32.totalorder %s1575_s16, %s1571_s15  ;;  %p54_p6 = scmp.eq.s32.totalorder %s1108_s23, 0 }
  0x12   : > { %s113_s30 = sadd.s32 1, %s1567_s14  ;;  %s2038_s26 = smov (%p33_p4, %s2036_s26), 0 }
  0x13   : > { %2015 = sst [smem:[#allocation12_spill]] %s2038_s26  ;;  %p1703_p7 = por %p54_p6, %p53_p5 }
  0x14   : > { %p123_p8 = scmp.ne.s32.totalorder %s1567_s14, %s1563_s13  ;;  %s35_s5 = ssub.s32 %s1595_s21, %s2038_s26 }
  0x15   : > { %p124_p9 = scmp.eq.s32.totalorder %s1108_s23, 3  ;;  %s37_s6 = sor.u32 %s36_s28, %s35_s5 }
  0x16   : > { %p111_p10 = scmp.eq.s32.totalorder %s35_s5, 0  ;;  %p38_p11 = scmp.eq.s32.totalorder %s37_s6, 0 }
  0x17   : > { %p1711_p12 = por %p124_p9, %p123_p8  ;;  %p129_p13 = scmp.ne.s32.totalorder %s1563_s13, %s1559_s12 }
  0x18   : > { %s1716_s8 = scalar_select %p111_p10, %s1567_s14, %s113_s30  }
  0x19   : > { %s1719_s9 = scalar_select %p38_p11, %s1579_s17, %s40_s27  }
  0x1a   : > { %p130_p0 = scmp.eq.s32.totalorder %s1109_s24, 3  ;;  %p1351_p1 = scmp.lt.s32.totalorder %s1599_s22, 4 }
  0x1b   : > { %2018 = sst [smem:[#allocation13_spill]] %s1719_s9  ;;  %s153_s11 = sand.u32 1, %s1579_s17  }
  0x1c   : > { %p1724_p2 = por %p130_p0, %p129_p13  ;;  %s1112_s15 = sshll.u32 %s153_s11, 9 }
  0x1d   : > { %s1114_s23 = sshll.u32 %s1591_s20, 1  ;;  %s1149_s28 = sshll.u32 %s1595_s21, 7 }
  0x1e   : > { %s157_s5 = scalar_lea.vmem [#allocation3], %s1112_s15  ;;  %s164_s26 = sadd.s32 %s1149_s28, %s1114_s23 }
  0x1f   : > { %s167_s6 = sshll.u32 %s157_s5, 4  ;;  %s1116_s30 = sshll.u32 %s164_s26, 7  ;;  %s168_s6 = int_to_ptr.vmem [resolvable:$true] %s167_s6 }
  0x20   : > { %p1733_p4 = pnand %p1351_p1, %p1695_p3  ;;  %s166_s9 = scalar_lea.hbm %s2003_s0, %s1116_s30 }
  0x21   : > { %p1117_p5 = scmp.ge.s32.totalorder %s1599_s22, 1  ;;  %s154_s17 = scalar_lea.sflag [#allocation4], %s153_s11 }
  0x22   : > { %p1453_p6 = pneg %p1733_p4  ;;  %s1464_s21 = scalar_lea.vmem %s168_s6, 8192 }
  0x23   : > { %p1465_p8 = scmp.ne.s32.totalorder %s168_s6, %s1464_s21  ;;  %s1601_s15 = smov [#allocation3]  }
  0x24   : > { %s1469_s26 = sshll.u32 %s1601_s15, 4  ;;  %s1470_s26 = int_to_ptr.vmem [resolvable:$false] %s1469_s26 }
  0x25   : > { %p1467_p9 = pnand %p1465_p8, %p1453_p6  ;;  %s1471_s29 = scalar_lea.vmem %s1470_s26, 16384 }
  0x26   : > { %p1472_p3 = scmp.lt.s32.totalorder %s168_s6, %s1470_s26  ;;  %p1473_p11 = scmp.lt.s32.totalorder %s1471_s29, %s1464_s21 }
  0x27   : > { %p1468_p10 = pneg %p1467_p9 }
  0x28   : > { %p1474_p13 = por %p1473_p11, %p1472_p3 }
  0x2a   : > { %p1475_p0 = pnand %p1474_p13, %p1468_p10 }
  0x2c   : > { %1478 = shalt.err (!%p1475_p0)
}
  0x2d   : > { %s1602_s25 = smov 512   ;;  %s1603_s11 = smov 256  }
  0x2e   : > { %s1604_s23 = smov 16   ;;  %p184_p1 = scmp.lt.s32.totalorder %s1599_s22, 5 }
  0x2f   : > { %1346 = dma.hbm_to_vmem [thread:$0]  (!%p1733_p4), %s166_s9, 8192, %s168_s6, %s154_s17, %s1602_s25, %s1603_s11, %s1604_s23  }
  0x30   : > { %p185_p6 = pnand %p1117_p5, %p184_p1 }
  0x31   : > { %s190_s28 = sand.u32 (!%p185_p6), 1, %s1575_s16  }
  0x32   : > { %188 = sbr.rel (%p185_p6) target bundleno = 711 (0x2c7), region = 32  ;;  %s1118_s5 = sshll.u32 (!%p185_p6), %s190_s28, 9 }
  0x33   : > { %s191_s21 = scalar_lea.sflag (!%p185_p6), [#allocation4], %s190_s28  ;;  %s1749_s30 = scalar_lea.vmem (!%p185_p6), [#allocation3], %s1118_s5 }
  0x37   : > { %1550 = dma.done.wait (%p1703_p7), %s191_s21, 8192  }
  0x38   : > { %1552 = vsyncadd (%p1703_p7), %s191_s21, 4294959104  ;;  %s219_s17 = sand.u32 1, %s1563_s13   ;;  %s1120_s9 = sshll.u32 %s1583_s18, 5 }
  0x39   : > { %s1119_s6 = sshll.u32 %s219_s17, 8  ;;  %p225_p4 = scmp.lt.s32.totalorder %s1120_s9, 63 }
  0x3a   : > { %s1764_s29 = scalar_lea.vmem [#allocation6], %s1119_s6  ;;  %p1122_p5 = scmp.ne.s32.totalorder %s1583_s18, 0 }
  0x3b   : > { %s2040_s9 = smov (!%p225_p4, %s1120_s9), 63 }
  0x3c   : > { %s1121_s27 = sshll.u32 %s2040_s9, 3  ;;  %235 = sbr.rel (%p1122_p5) target bundleno = 82 (0x52), region = 40 }
  0x3d   : > { %s1762_s26 = scalar_lea.vmem %s2004_s1, %s1121_s27 }
  0x41   : > { %v1605_v0 = vmov 0.0  }
  0x42   : > { %236 = vst [vmem:[#allocation2 + $0xb0] sm:$0xff] %v1605_v0  ;;  %237 = vst [vmem:[#allocation2] sm:$0xff] %v1605_v0 }
  0x43   : > { %238 = vst [vmem:[#allocation2 + $0xd8] sm:$0xff] %v1605_v0  ;;  %239 = vst [vmem:[#allocation2 + $0x18] sm:$0xff] %v1605_v0 }
  0x44   : > { %240 = vst [vmem:[#allocation2 + $0x50] sm:$0xff] %v1605_v0  ;;  %241 = vst [vmem:[#allocation2 + $0x68] sm:$0xff] %v1605_v0 }
  0x45   : > { %242 = vst [vmem:[#allocation2 + $0x30] sm:$0xff] %v1605_v0  ;;  %243 = vst [vmem:[#allocation2 + $0x48] sm:$0xff] %v1605_v0 }
  0x46   : > { %244 = vst [vmem:[#allocation2 + $0x80] sm:$0xff] %v1605_v0  ;;  %245 = vst [vmem:[#allocation2 + $0x88] sm:$0xff] %v1605_v0 }
  0x47   : > { %246 = vst [vmem:[#allocation2 + $0xe8] sm:$0xff] %v1605_v0  ;;  %247 = vst [vmem:[#allocation2 + $0xb8] sm:$0xff] %v1605_v0 }
  0x48   : > { %248 = vst [vmem:[#allocation2 + $0x60] sm:$0xff] %v1605_v0  ;;  %249 = vst [vmem:[#allocation2 + $0xf0] sm:$0xff] %v1605_v0 }
  0x49   : > { %250 = vst [vmem:[#allocation2 + $0x8] sm:$0xff] %v1605_v0  ;;  %251 = vst [vmem:[#allocation2 + $0x78] sm:$0xff] %v1605_v0 }
  0x4a   : > { %252 = vst [vmem:[#allocation2 + $0x38] sm:$0xff] %v1605_v0  ;;  %253 = vst [vmem:[#allocation2 + $0x58] sm:$0xff] %v1605_v0 }
  0x4b   : > { %254 = vst [vmem:[#allocation2 + $0x40] sm:$0xff] %v1605_v0  ;;  %255 = vst [vmem:[#allocation2 + $0xc8] sm:$0xff] %v1605_v0 }
  0x4c   : > { %256 = vst [vmem:[#allocation2 + $0xe0] sm:$0xff] %v1605_v0  ;;  %257 = vst [vmem:[#allocation2 + $0x90] sm:$0xff] %v1605_v0 }
  0x4d   : > { %258 = vst [vmem:[#allocation2 + $0x70] sm:$0xff] %v1605_v0  ;;  %259 = vst [vmem:[#allocation2 + $0xc0] sm:$0xff] %v1605_v0 }
  0x4e   : > { %260 = vst [vmem:[#allocation2 + $0xa8] sm:$0xff] %v1605_v0  ;;  %261 = vst [vmem:[#allocation2 + $0xd0] sm:$0xff] %v1605_v0 }
  0x4f   : > { %262 = vst [vmem:[#allocation2 + $0x10] sm:$0xff] %v1605_v0  ;;  %263 = vst [vmem:[#allocation2 + $0x28] sm:$0xff] %v1605_v0 }
  0x50   : > { %264 = vst [vmem:[#allocation2 + $0xa0] sm:$0xff] %v1605_v0  ;;  %265 = vst [vmem:[#allocation2 + $0xf8] sm:$0xff] %v1605_v0 }
  0x51   : > { %266 = vst [vmem:[#allocation2 + $0x20] sm:$0xff] %v1605_v0  ;;  %267 = vst [vmem:[#allocation2 + $0x98] sm:$0xff] %v1605_v0 }
  0x52 PF: > { %v1447_v1 = vld [vmem:[%s2005_s2 + $0x18] sm:$0xff]   ;;  %v1448_v2 = vld [vmem:[%s2005_s2 + $0x10] sm:$0xff]   ;;  %v1449_v3 = vld [vmem:[%s2005_s2 + $0x8] sm:$0xff]   ;;  %vm348_vm0 = vcmask 523264   ;;  %p1143_p7 = scmp.ne.s32.totalorder %s1583_s18, 1 }
  0x53   : > { %1283 = vmatprep.subr.bf16.mxu0 %v1447_v1  ;;  %v268_v4 = vld [vmem:[%s1762_s26] sm:$0xff]  ;;  %v269_v5 = vld [vmem:[%s1762_s26 + $0x8] sm:$0xff]  ;;  %v270_v8 = vld [vmem:[%s1762_s26 + $0x10] sm:$0xff] }
  0x54   : > { %1284 = vmatpush3.bf16.msra.mxu0 %v1447_v1  ;;  %v300_v6 = vpack.c.bf16 %v269_v5, %v268_v4  ;;  %v1450_v7 = vld [vmem:[%s2005_s2] sm:$0xff]   ;;  %v271_v9 = vld [vmem:[%s1762_s26 + $0x18] sm:$0xff]  ;;  %v273_v11 = vld [vmem:[%s1762_s26 + $0x28] sm:$0xff] }
  0x55   : > { %1285 = vmatprep.subr.bf16.mxu0 %v1448_v2  ;;  %v272_v10 = vld [vmem:[%s1762_s26 + $0x20] sm:$0xff]  ;;  %v301_v12 = vpack.c.bf16 %v271_v9, %v270_v8  ;;  %v274_v14 = vld [vmem:[%s1762_s26 + $0x30] sm:$0xff]  ;;  %v275_v15 = vld [vmem:[%s1762_s26 + $0x38] sm:$0xff] }
  0x56   : > { %1291 = vmatprep.mubr.msk.bf16.mxu0 %vm348_vm0, %v300_v6  ;;  %v302_v13 = vpack.c.bf16 %v273_v11, %v272_v10  ;;  %v276_v16 = vld [vmem:[%s1762_s26 + $0x40] sm:$0xff]  ;;  %v277_v17 = vld [vmem:[%s1762_s26 + $0x48] sm:$0xff]  ;;  %v303_v18 = vpack.c.bf16 %v275_v15, %v274_v14  ;;  %v278_v20 = vld [vmem:[%s1762_s26 + $0x50] sm:$0xff] }
  0x57   : > { %v304_v19 = vpack.c.bf16 %v277_v17, %v276_v16  ;;  %v279_v21 = vld [vmem:[%s1762_s26 + $0x58] sm:$0xff]  ;;  %v280_v22 = vld [vmem:[%s1762_s26 + $0x60] sm:$0xff]  ;;  %v281_v23 = vld [vmem:[%s1762_s26 + $0x68] sm:$0xff] }
  0x58   : > { %1286 = vmatpush3.bf16.msra.mxu0 %v1448_v2  ;;  %v305_v24 = vpack.c.bf16 %v279_v21, %v278_v20  ;;  %v306_v25 = vpack.c.bf16 %v281_v23, %v280_v22  ;;  %v282_v26 = vld [vmem:[%s1762_s26 + $0x70] sm:$0xff]  ;;  %v283_v27 = vld [vmem:[%s1762_s26 + $0x78] sm:$0xff]  ;;  %v284_v28 = vld [vmem:[%s1762_s26 + $0x80] sm:$0xff] }
  0x59   : > { %1287 = vmatprep.subr.bf16.mxu0 %v1449_v3  ;;  %v285_v29 = vld [vmem:[%s1762_s26 + $0x88] sm:$0xff]  ;;  %v307_v30 = vpack.c.bf16 %v283_v27, %v282_v26  ;;  %v286_v32 = vld [vmem:[%s1762_s26 + $0x90] sm:$0xff]  ;;  %v287_v33 = vld [vmem:[%s1762_s26 + $0x98] sm:$0xff] }
  0x5a   : > { %v308_v31 = vpack.c.bf16 %v285_v29, %v284_v28  ;;  %v288_v34 = vld [vmem:[%s1762_s26 + $0xa0] sm:$0xff]  ;;  %v289_v35 = vld [vmem:[%s1762_s26 + $0xa8] sm:$0xff]  ;;  %v309_v36 = vpack.c.bf16 %v287_v33, %v286_v32  ;;  %v290_v38 = vld [vmem:[%s1762_s26 + $0xb0] sm:$0xff] }
  0x5b   : > { %v310_v37 = vpack.c.bf16 %v289_v35, %v288_v34  ;;  %v291_v39 = vld [vmem:[%s1762_s26 + $0xb8] sm:$0xff]  ;;  %v292_v40 = vld [vmem:[%s1762_s26 + $0xc0] sm:$0xff]  ;;  %v293_v41 = vld [vmem:[%s1762_s26 + $0xc8] sm:$0xff] }
  0x5c   : > { %1288 = vmatpush3.bf16.msra.mxu0 %v1449_v3  ;;  %v311_v42 = vpack.c.bf16 %v291_v39, %v290_v38  ;;  %v312_v43 = vpack.c.bf16 %v293_v41, %v292_v40  ;;  %v294_v44 = vld [vmem:[%s1762_s26 + $0xd0] sm:$0xff]  ;;  %v295_v45 = vld [vmem:[%s1762_s26 + $0xd8] sm:$0xff]  ;;  %v296_v46 = vld [vmem:[%s1762_s26 + $0xe0] sm:$0xff] }
  0x5d   : > { %1289 = vmatprep.subr.bf16.mxu0 %v1450_v7  ;;  %v297_v47 = vld [vmem:[%s1762_s26 + $0xe8] sm:$0xff]  ;;  %v313_v48 = vpack.c.bf16 %v295_v45, %v294_v44  ;;  %v298_v50 = vld [vmem:[%s1762_s26 + $0xf0] sm:$0xff]  ;;  %v299_v51 = vld [vmem:[%s1762_s26 + $0xf8] sm:$0xff] }
  0x5e   : > { %v314_v49 = vpack.c.bf16 %v297_v47, %v296_v46  ;;  %v315_v52 = vpack.c.bf16 %v299_v51, %v298_v50  ;;  %v627_v53 = vld [vmem:[%s1749_s30 + $0xa8] sm:$0xff]  ;;  %v629_v54 = vld [vmem:[%s1749_s30 + $0xb8] sm:$0xff]  ;;  %v628_v44 = vld [vmem:[%s1749_s30 + $0xb0] sm:$0xff] }
  0x5f   : > { %v681_v55 = vpack.c.bf16 %v629_v54, %v627_v53  ;;  %v607_v60 = vld [vmem:[%s1749_s30 + $0x8] sm:$0xff]  ;;  %v609_v61 = vld [vmem:[%s1749_s30 + $0x18] sm:$0xff]  ;;  %v606_v46 = vld [vmem:[%s1749_s30] sm:$0xff] }
  0x60   : > { %1290 = vmatpush3.bf16.msra.mxu0 %v1450_v7  ;;  %v671_v63 = vpack.c.bf16 %v609_v61, %v607_v60  ;;  %v631_v45 = vld [vmem:[%s1749_s30 + $0xc8] sm:$0xff]  ;;  %v608_v47 = vld [vmem:[%s1749_s30 + $0x10] sm:$0xff]  ;;  %v613_v50 = vld [vmem:[%s1749_s30 + $0x38] sm:$0xff] }
  0x61   : > { %774 = vmatprep.mubr.bf16.mxu1 %v681_v55  ;;  %v630_v55 = vld [vmem:[%s1749_s30 + $0xc0] sm:$0xff]  ;;  %v637_v60 = vld [vmem:[%s1749_s30 + $0xf8] sm:$0xff]  ;;  %v615_v61 = vld [vmem:[%s1749_s30 + $0x48] sm:$0xff] }
  0x63   : > { %1292 = vmatmul.mubr.msk.bf16.vlgmr.msra.gmra.mxu0 %vm348_vm0, %v301_v12 }
  0x64   : > { %1295 = vmatprep.mubr.msk.bf16.mxu0 %vm348_vm0, %v302_v13 }
  0x6b   : > { %1296 = vmatmul.mubr.msk.bf16.gmra.mxu0 %vm348_vm0, %v303_v18 }
  0x6c   : > { %1299 = vmatprep.mubr.msk.bf16.mxu0 %vm348_vm0, %v304_v19 }
  0x73   : > { %1300 = vmatmul.mubr.msk.bf16.gmra.mxu0 %vm348_vm0, %v305_v24 }
  0x74   : > { %1303 = vmatprep.mubr.msk.bf16.mxu0 %vm348_vm0, %v306_v25 }
  0x7b   : > { %1304 = vmatmul.mubr.msk.bf16.gmra.mxu0 %vm348_vm0, %v307_v30 }
  0x7c   : > { %1307 = vmatprep.mubr.msk.bf16.mxu0 %vm348_vm0, %v308_v31 }
  0x83   : > { %1308 = vmatmul.mubr.msk.bf16.gmra.mxu0 %vm348_vm0, %v309_v36 }
  0x84   : > { %1311 = vmatprep.mubr.msk.bf16.mxu0 %vm348_vm0, %v310_v37 }
  0x8b   : > { %1312 = vmatmul.mubr.msk.bf16.gmra.mxu0 %vm348_vm0, %v311_v42 }
  0x8c   : > { %1315 = vmatprep.mubr.msk.bf16.mxu0 %vm348_vm0, %v312_v43  ;;  %v626_v43 = vld [vmem:[%s1749_s30 + $0xa0] sm:$0xff] }
  0x8d   : > { %v680_v51 = vpack.c.bf16 %v628_v44, %v626_v43  ;;  %v652_v43 = vld [vmem:[%s1749_s30 + $0x170] sm:$0xff]  ;;  %v655_v44 = vld [vmem:[%s1749_s30 + $0x188] sm:$0xff] }
  0x93   : > { %1316 = vmatmul.mubr.msk.bf16.gmra.mxu0 %vm348_vm0, %v313_v48  ;;  %v633_v48 = vld [vmem:[%s1749_s30 + $0xd8] sm:$0xff] }
  0x94   : > { %1319 = vmatprep.mubr.msk.bf16.mxu0 %vm348_vm0, %v314_v49  ;;  %v611_v49 = vld [vmem:[%s1749_s30 + $0x28] sm:$0xff]  ;;  %v683_v53 = vpack.c.bf16 %v633_v48, %v631_v45  ;;  %v657_v45 = vld [vmem:[%s1749_s30 + $0x198] sm:$0xff]  ;;  %v654_v48 = vld [vmem:[%s1749_s30 + $0x180] sm:$0xff] }
  0x95   : > { %v673_v54 = vpack.c.bf16 %v613_v50, %v611_v49  ;;  %v656_v49 = vld [vmem:[%s1749_s30 + $0x190] sm:$0xff]  ;;  %v659_v50 = vld [vmem:[%s1749_s30 + $0x1a8] sm:$0xff] }
  0x9b   : > { %1320 = vmatmul.mubr.msk.bf16.gmra.mxu0 %vm348_vm0, %v315_v52  ;;  %v670_v52 = vpack.c.bf16 %v608_v47, %v606_v46  ;;  %v695_v47 = vpack.c.bf16 %v657_v45, %v655_v44 }
  0x9c   : > { %734 = vmatprep.mubr.bf16.mxu0 %v671_v63 }
 0x123   : > { %v1293_v56 = vpop.f32.mrf.mxu0 }
 0x125   : > { %v431_v57 = vpop.f32.mrf.mxu0 }
 0x127   : > { %v1294_v58 = vpop.f32.mrf.mxu0 }
 0x128   : > { %v1829_v59 = vpack.c.bf16 %v1294_v58, %v1293_v56  ;;  %v632_v56 = vld [vmem:[%s1749_s30 + $0xd0] sm:$0xff]  ;;  %v610_v58 = vld [vmem:[%s1749_s30 + $0x20] sm:$0xff] }
 0x129   : > { %v434_v62 = vpop.f32.mrf.mxu0  ;;  %v682_v63 = vpack.c.bf16 %v632_v56, %v630_v55  ;;  %v660_v55 = vld [vmem:[%s1749_s30 + $0x1b0] sm:$0xff]  ;;  %v663_v56 = vld [vmem:[%s1749_s30 + $0x1c8] sm:$0xff] }
 0x12a   : > { %v1833_v0 = vpack.c.bf16 %v434_v62, %v431_v57  ;;  %v635_v57 = vld [vmem:[%s1749_s30 + $0xe8] sm:$0xff]  ;;  %v617_v62 = vld [vmem:[%s1749_s30 + $0x58] sm:$0xff] }
 0x12b   : > { %v1297_v1 = vpop.f32.mrf.mxu0 }
 0x12d   : > { %v447_v2 = vpop.f32.mrf.mxu0 }
 0x12f   : > { %v1298_v3 = vpop.f32.mrf.mxu0 }
 0x130   : > { %v561_v4 = vpack.c.bf16 %v1298_v3, %v1297_v1  ;;  %v685_v1 = vpack.c.bf16 %v637_v60, %v635_v57  ;;  %v634_v3 = vld [vmem:[%s1749_s30 + $0xe0] sm:$0xff]  ;;  %v665_v57 = vld [vmem:[%s1749_s30 + $0x1d8] sm:$0xff] }
 0x131   : > { %v450_v5 = vpop.f32.mrf.mxu0  ;;  %v662_v60 = vld [vmem:[%s1749_s30 + $0x1c0] sm:$0xff] }
 0x132   : > { %v560_v6 = vpack.c.bf16 %v450_v5, %v447_v2  ;;  %v675_v2 = vpack.c.bf16 %v617_v62, %v615_v61  ;;  %v639_v5 = vld [vmem:[%s1749_s30 + $0x108] sm:$0xff]  ;;  %v664_v61 = vld [vmem:[%s1749_s30 + $0x1d0] sm:$0xff] }
 0x133   : > { %v1301_v7 = vpop.f32.mrf.mxu0  ;;  %v667_v62 = vld [vmem:[%s1749_s30 + $0x1e8] sm:$0xff] }
 0x135   : > { %v463_v8 = vpop.f32.mrf.mxu0 }
 0x137   : > { %v1302_v9 = vpop.f32.mrf.mxu0 }
 0x138   : > { %v563_v36 = vpack.c.bf16 %v1302_v9, %v1301_v7  ;;  %v616_v7 = vld [vmem:[%s1749_s30 + $0x50] sm:$0xff]  ;;  %v619_v9 = vld [vmem:[%s1749_s30 + $0x68] sm:$0xff] }
 0x139   : > { %v466_v10 = vpop.f32.mrf.mxu0 }
 0x13a   : > { %v562_v38 = vpack.c.bf16 %v466_v10, %v463_v8  ;;  %v641_v8 = vld [vmem:[%s1749_s30 + $0x118] sm:$0xff] }
 0x13b   : > { %v1305_v11 = vpop.f32.mrf.mxu0  ;;  %v621_v10 = vld [vmem:[%s1749_s30 + $0x78] sm:$0xff] }
 0x13d   : > { %v479_v12 = vpop.f32.mrf.mxu0 }
 0x13f   : > { %v1306_v13 = vpop.f32.mrf.mxu0 }
 0x140   : > { %v565_v31 = vpack.c.bf16 %v1306_v13, %v1305_v11  ;;  %v687_v13 = vpack.c.bf16 %v641_v8, %v639_v5 }
 0x141   : > { %v482_v14 = vpop.f32.mrf.mxu0 }
 0x142   : > { %v564_v34 = vpack.c.bf16 %v482_v14, %v479_v12  ;;  %v677_v14 = vpack.c.bf16 %v621_v10, %v619_v9  ;;  %v574_v9 = vld [vmem:[#allocation2 + $0xb0] sm:$0xff] }
 0x143   : > { %v1309_v15 = vpop.f32.mrf.mxu0 }
 0x145   : > { %v495_v16 = vpop.f32.mrf.mxu0 }
 0x147   : > { %v1310_v17 = vpop.f32.mrf.mxu0 }
 0x148   : > { %v567_v41 = vpack.c.bf16 %v1310_v17, %v1309_v15  ;;  %v638_v15 = vld [vmem:[%s1749_s30 + $0x100] sm:$0xff]  ;;  %v643_v17 = vld [vmem:[%s1749_s30 + $0x128] sm:$0xff] }
 0x149   : > { %v498_v18 = vpop.f32.mrf.mxu0 }
 0x14a   : > { %v566_v42 = vpack.c.bf16 %v498_v18, %v495_v16  ;;  %v640_v16 = vld [vmem:[%s1749_s30 + $0x110] sm:$0xff]  ;;  %v618_v18 = vld [vmem:[%s1749_s30 + $0x60] sm:$0xff] }
 0x14b   : > { %v1313_v19 = vpop.f32.mrf.mxu0 }
 0x14d   : > { %v511_v20 = vpop.f32.mrf.mxu0 }
 0x14f   : > { %v1314_v21 = vpop.f32.mrf.mxu0 }
 0x150   : > { %v569_v39 = vpack.c.bf16 %v1314_v21, %v1313_v19  ;;  %v620_v19 = vld [vmem:[%s1749_s30 + $0x70] sm:$0xff]  ;;  %v623_v21 = vld [vmem:[%s1749_s30 + $0x88] sm:$0xff] }
 0x151   : > { %v514_v22 = vpop.f32.mrf.mxu0 }
 0x152   : > { %v568_v40 = vpack.c.bf16 %v514_v22, %v511_v20  ;;  %v645_v20 = vld [vmem:[%s1749_s30 + $0x138] sm:$0xff] }
 0x153   : > { %v1317_v23 = vpop.f32.mrf.mxu0  ;;  %v625_v22 = vld [vmem:[%s1749_s30 + $0x98] sm:$0xff] }
 0x155   : > { %v527_v24 = vpop.f32.mrf.mxu0 }
 0x157   : > { %v1318_v25 = vpop.f32.mrf.mxu0 }
 0x158   : > { %v571_v35 = vpack.c.bf16 %v1318_v25, %v1317_v23  ;;  %v686_v23 = vpack.c.bf16 %v640_v16, %v638_v15  ;;  %v689_v25 = vpack.c.bf16 %v645_v20, %v643_v17  ;;  %v585_v17 = vld [vmem:[#allocation2 + $0xb8] sm:$0xff] }
 0x159   : > { %v530_v26 = vpop.f32.mrf.mxu0 }
 0x15a   : > { %v570_v37 = vpack.c.bf16 %v530_v26, %v527_v24  ;;  %v676_v24 = vpack.c.bf16 %v620_v19, %v618_v18  ;;  %v679_v26 = vpack.c.bf16 %v625_v22, %v623_v21  ;;  %v575_v19 = vld [vmem:[#allocation2] sm:$0xff] }
 0x15b   : > { %v1321_v27 = vpop.f32.mrf.mxu0 }
 0x15d   : > { %v543_v28 = vpop.f32.mrf.mxu0 }
 0x15f   : > { %v1322_v29 = vpop.f32.mrf.mxu0 }
 0x160   : > { %v573_v30 = vpack.c.bf16 %v1322_v29, %v1321_v27  ;;  %v642_v27 = vld [vmem:[%s1749_s30 + $0x120] sm:$0xff] }
 0x161   : > { %v546_v32 = vpop.f32.mrf.mxu0  ;;  %v622_v29 = vld [vmem:[%s1749_s30 + $0x80] sm:$0xff] }
 0x162   : > { %v572_v33 = vpack.c.bf16 %v546_v32, %v543_v28  ;;  %1171 = vmatprep.subr.bf16.mxu0 %v573_v30  ;;  %1323 = vmatprep.subr.bf16.mxu1 %v573_v30  ;;  %v644_v28 = vld [vmem:[%s1749_s30 + $0x130] sm:$0xff]  ;;  %v649_v32 = vld [vmem:[%s1749_s30 + $0x158] sm:$0xff] }
 0x163   : > { %1172 = vmatpush3.bf16.msra.mxu0 %v565_v31  ;;  %1331 = vmatpush3.bf16.msra.mxu1 %v565_v31  ;;  %v624_v30 = vld [vmem:[%s1749_s30 + $0x90] sm:$0xff]  ;;  %v647_v31 = vld [vmem:[%s1749_s30 + $0x148] sm:$0xff] }
 0x164   : > { %1173 = vmatprep.subr.bf16.mxu0 %v572_v33  ;;  %1324 = vmatprep.subr.bf16.mxu1 %v572_v33  ;;  %v688_v33 = vpack.c.bf16 %v644_v28, %v642_v27  ;;  %v586_v27 = vld [vmem:[#allocation2 + $0x60] sm:$0xff] }
 0x167   : > { %1174 = vmatpush3.bf16.msra.mxu0 %v564_v34  ;;  %1332 = vmatpush3.bf16.msra.mxu1 %v564_v34  ;;  %v678_v34 = vpack.c.bf16 %v624_v30, %v622_v29  ;;  %v576_v29 = vld [vmem:[#allocation2 + $0xd8] sm:$0xff] }
 0x168   : > { %1175 = vmatprep.subr.bf16.mxu0 %v571_v35  ;;  %1325 = vmatprep.subr.bf16.mxu1 %v571_v35  ;;  %v691_v35 = vpack.c.bf16 %v649_v32, %v647_v31 }
 0x16b   : > { %1176 = vmatpush3.bf16.msra.mxu0 %v563_v36  ;;  %1333 = vmatpush3.bf16.msra.mxu1 %v563_v36  ;;  %v646_v36 = vld [vmem:[%s1749_s30 + $0x140] sm:$0xff] }
 0x16c   : > { %1177 = vmatprep.subr.bf16.mxu0 %v570_v37  ;;  %1326 = vmatprep.subr.bf16.mxu1 %v570_v37  ;;  %v648_v37 = vld [vmem:[%s1749_s30 + $0x150] sm:$0xff] }
 0x16f   : > { %1178 = vmatpush3.bf16.msra.mxu0 %v562_v38  ;;  %1334 = vmatpush3.bf16.msra.mxu1 %v562_v38  ;;  %v651_v38 = vld [vmem:[%s1749_s30 + $0x168] sm:$0xff] }
 0x170   : > { %1179 = vmatprep.subr.bf16.mxu0 %v569_v39  ;;  %1327 = vmatprep.subr.bf16.mxu1 %v569_v39  ;;  %v653_v39 = vld [vmem:[%s1749_s30 + $0x178] sm:$0xff] }
 0x173   : > { %1180 = vmatpush3.bf16.msra.mxu0 %v561_v4  ;;  %1335 = vmatpush3.bf16.msra.mxu1 %v561_v4  ;;  %v636_v4 = vld [vmem:[%s1749_s30 + $0xf0] sm:$0xff] }
 0x174   : > { %1181 = vmatprep.subr.bf16.mxu0 %v568_v40  ;;  %1328 = vmatprep.subr.bf16.mxu1 %v568_v40  ;;  %v684_v11 = vpack.c.bf16 %v636_v4, %v634_v3  ;;  %v690_v40 = vpack.c.bf16 %v648_v37, %v646_v36  ;;  %v668_v3 = vld [vmem:[%s1749_s30 + $0x1f0] sm:$0xff] }
 0x175   : > { %v587_v37 = vld [vmem:[#allocation2 + $0xf0] sm:$0xff] }
 0x177   : > { %1182 = vmatpush3.bf16.msra.mxu0 %v560_v6  ;;  %1336 = vmatpush3.bf16.msra.mxu1 %v560_v6  ;;  %v614_v6 = vld [vmem:[%s1749_s30 + $0x40] sm:$0xff] }
 0x178   : > { %1183 = vmatprep.subr.bf16.mxu0 %v567_v41  ;;  %1329 = vmatprep.subr.bf16.mxu1 %v567_v41  ;;  %v674_v12 = vpack.c.bf16 %v616_v7, %v614_v6  ;;  %v693_v41 = vpack.c.bf16 %v653_v39, %v651_v38  ;;  %v584_v7 = vld [vmem:[#allocation2 + $0xe8] sm:$0xff]  ;;  %v577_v39 = vld [vmem:[#allocation2 + $0x18] sm:$0xff] }
 0x17b   : > { %1184 = vmatpush3.bf16.msra.mxu0 %v1829_v59  ;;  %1337 = vmatpush3.bf16.msra.mxu1 %v1829_v59  ;;  %v612_v59 = vld [vmem:[%s1749_s30 + $0x30] sm:$0xff] }
 0x17c   : > { %1185 = vmatprep.subr.bf16.mxu0 %v566_v42  ;;  %1330 = vmatprep.subr.bf16.mxu1 %v566_v42  ;;  %v650_v42 = vld [vmem:[%s1749_s30 + $0x160] sm:$0xff] }
 0x17d   : > { %v692_v46 = vpack.c.bf16 %v652_v43, %v650_v42 }
 0x17f   : > { %1186 = vmatpush3.bf16.msra.mxu0 %v1833_v0  ;;  %1338 = vmatpush3.bf16.msra.mxu1 %v1833_v0  ;;  %v672_v0 = vpack.c.bf16 %v612_v59, %v610_v58  ;;  %v699_v59 = vpack.c.bf16 %v665_v57, %v663_v56  ;;  %v589_v57 = vld [vmem:[#allocation2 + $0x78] sm:$0xff] }
 0x182   : > { %775 = vmatmul.mubr.bf16.vlgmr.msra.gmra.mxu1 %v680_v51  ;;  %735 = vmatmul.mubr.bf16.vlgmr.msra.gmra.mxu0 %v670_v52  ;;  %v661_v51 = vld [vmem:[%s1749_s30 + $0x1b8] sm:$0xff]  ;;  %v694_v52 = vpack.c.bf16 %v656_v49, %v654_v48  ;;  %v578_v49 = vld [vmem:[#allocation2 + $0x50] sm:$0xff] }
 0x183   : > { %782 = vmatprep.mubr.bf16.mxu1 %v683_v53  ;;  %742 = vmatprep.mubr.bf16.mxu0 %v673_v54  ;;  %v697_v53 = vpack.c.bf16 %v661_v51, %v659_v50  ;;  %v658_v54 = vld [vmem:[%s1749_s30 + $0x1a0] sm:$0xff] }
 0x184   : > { %v696_v58 = vpack.c.bf16 %v660_v55, %v658_v54 }
 0x18a   : > { %783 = vmatmul.mubr.bf16.gmra.mxu1 %v682_v63  ;;  %743 = vmatmul.mubr.bf16.gmra.mxu0 %v672_v0  ;;  %v669_v63 = vld [vmem:[%s1749_s30 + $0x1f8] sm:$0xff]  ;;  %v698_v0 = vpack.c.bf16 %v664_v61, %v662_v60 }
 0x18b   : > { %790 = vmatprep.mubr.bf16.mxu1 %v685_v1  ;;  %750 = vmatprep.mubr.bf16.mxu0 %v675_v2  ;;  %v701_v1 = vpack.c.bf16 %v669_v63, %v667_v62  ;;  %v666_v2 = vld [vmem:[%s1749_s30 + $0x1e0] sm:$0xff] }
 0x18c   : > { %v700_v4 = vpack.c.bf16 %v668_v3, %v666_v2  ;;  %v590_v3 = vld [vmem:[#allocation2 + $0x38] sm:$0xff] }
 0x192   : > { %791 = vmatmul.mubr.bf16.gmra.mxu1 %v684_v11  ;;  %751 = vmatmul.mubr.bf16.gmra.mxu0 %v674_v12 }
 0x193   : > { %798 = vmatprep.mubr.bf16.mxu1 %v687_v13  ;;  %758 = vmatprep.mubr.bf16.mxu0 %v677_v14 }
 0x19a   : > { %799 = vmatmul.mubr.bf16.gmra.mxu1 %v686_v23  ;;  %759 = vmatmul.mubr.bf16.gmra.mxu0 %v676_v24 }
 0x19b   : > { %806 = vmatprep.mubr.bf16.mxu1 %v689_v25  ;;  %766 = vmatprep.mubr.bf16.mxu0 %v679_v26 }
 0x1a2   : > { %807 = vmatmul.mubr.bf16.gmra.mxu1 %v688_v33  ;;  %767 = vmatmul.mubr.bf16.gmra.mxu0 %v678_v34 }
 0x1a3   : > { %814 = vmatprep.mubr.bf16.mxu1 %v691_v35 }
 0x1aa   : > { %815 = vmatmul.mubr.bf16.gmra.mxu1 %v690_v40 }
 0x1ab   : > { %822 = vmatprep.mubr.bf16.mxu1 %v693_v41 }
 0x1b2   : > { %823 = vmatmul.mubr.bf16.gmra.mxu1 %v692_v46 }
 0x1b3   : > { %830 = vmatprep.mubr.bf16.mxu1 %v695_v47  ;;  %v588_v47 = vld [vmem:[#allocation2 + $0x8] sm:$0xff] }
 0x1ba   : > { %831 = vmatmul.mubr.bf16.gmra.mxu1 %v694_v52 }
 0x1bb   : > { %838 = vmatprep.mubr.bf16.mxu1 %v697_v53 }
 0x1c2   : > { %839 = vmatmul.mubr.bf16.gmra.mxu1 %v696_v58 }
 0x1c3   : > { %846 = vmatprep.mubr.bf16.mxu1 %v699_v59  ;;  %v579_v59 = vld [vmem:[#allocation2 + $0x68] sm:$0xff] }
 0x1ca   : > { %847 = vmatmul.mubr.bf16.gmra.mxu1 %v698_v0 }
 0x1cb   : > { %854 = vmatprep.mubr.bf16.mxu1 %v701_v1 }
 0x1d2   : > { %855 = vmatmul.mubr.bf16.gmra.mxu1 %v700_v4 }
 0x242   : > { %v1217_v5 = vpop.f32.mrf.mxu1  ;;  %v1187_v6 = vpop.f32.mrf.mxu0 }
 0x244   : > { %v1218_v8 = vpop.f32.mrf.mxu1  ;;  %v1188_v10 = vpop.f32.mrf.mxu0 }
 0x245   : > { %v1219_v11 = vadd.f32 %v1218_v8, %v1217_v5  ;;  %v1189_v12 = vadd.f32 %v1188_v10, %v1187_v6  ;;  %v580_v5 = vld [vmem:[#allocation2 + $0x30] sm:$0xff] }
 0x246   : > { %v1220_v13 = vpop.f32.mrf.mxu1  ;;  %v1190_v14 = vpop.f32.mrf.mxu0 }
 0x247   : > { %v873_v15 = vadd.f32 %v1219_v11, %v584_v7  ;;  %v863_v16 = vadd.f32 %v1189_v12, %v574_v9 }
 0x248   : > { %v1221_v18 = vpop.f32.mrf.mxu1  ;;  %v1191_v20 = vpop.f32.mrf.mxu0 }
 0x249   : > { %905 = vst [vmem:[#allocation2 + $0xe8] sm:$0xff] %v873_v15  ;;  %v1222_v21 = vadd.f32 %v1221_v18, %v1220_v13  ;;  %895 = vst [vmem:[#allocation2 + $0xb0] sm:$0xff] %v863_v16  ;;  %v1192_v22 = vadd.f32 %v1191_v20, %v1190_v14  ;;  %v591_v13 = vld [vmem:[#allocation2 + $0x58] sm:$0xff]  ;;  %v581_v15 = vld [vmem:[#allocation2 + $0x48] sm:$0xff] }
 0x24a   : > { %v1223_v23 = vpop.f32.mrf.mxu1  ;;  %v1193_v24 = vpop.f32.mrf.mxu0 }
 0x24b   : > { %v874_v25 = vadd.f32 %v1222_v21, %v585_v17  ;;  %v864_v26 = vadd.f32 %v1192_v22, %v575_v19 }
 0x24c   : > { %v1224_v28 = vpop.f32.mrf.mxu1  ;;  %v1194_v30 = vpop.f32.mrf.mxu0 }
 0x24d   : > { %906 = vst [vmem:[#allocation2 + $0xb8] sm:$0xff] %v874_v25  ;;  %v1225_v31 = vadd.f32 %v1224_v28, %v1223_v23  ;;  %896 = vst [vmem:[#allocation2] sm:$0xff] %v864_v26  ;;  %v1195_v32 = vadd.f32 %v1194_v30, %v1193_v24  ;;  %v592_v23 = vld [vmem:[#allocation2 + $0x40] sm:$0xff] }
 0x24e   : > { %v1226_v33 = vpop.f32.mrf.mxu1  ;;  %v1196_v34 = vpop.f32.mrf.mxu0  ;;  %v582_v25 = vld [vmem:[#allocation2 + $0x80] sm:$0xff] }
 0x24f   : > { %v875_v35 = vadd.f32 %v1225_v31, %v586_v27  ;;  %v865_v36 = vadd.f32 %v1195_v32, %v576_v29 }
 0x250   : > { %v1227_v38 = vpop.f32.mrf.mxu1  ;;  %v1197_v40 = vpop.f32.mrf.mxu0 }
 0x251   : > { %907 = vst [vmem:[#allocation2 + $0x60] sm:$0xff] %v875_v35  ;;  %v1228_v41 = vadd.f32 %v1227_v38, %v1226_v33  ;;  %897 = vst [vmem:[#allocation2 + $0xd8] sm:$0xff] %v865_v36  ;;  %v1198_v42 = vadd.f32 %v1197_v40, %v1196_v34  ;;  %v593_v33 = vld [vmem:[#allocation2 + $0xc8] sm:$0xff] }
 0x252   : > { %v1229_v43 = vpop.f32.mrf.mxu1  ;;  %v1199_v44 = vpop.f32.mrf.mxu0  ;;  %v583_v35 = vld [vmem:[#allocation2 + $0x88] sm:$0xff] }
 0x253   : > { %v876_v45 = vadd.f32 %v1228_v41, %v587_v37  ;;  %v866_v46 = vadd.f32 %v1198_v42, %v577_v39  ;;  %v594_v42 = vld [vmem:[#allocation2 + $0xe0] sm:$0xff] }
 0x254   : > { %v1230_v48 = vpop.f32.mrf.mxu1  ;;  %v1200_v50 = vpop.f32.mrf.mxu0 }
 0x255   : > { %908 = vst [vmem:[#allocation2 + $0xf0] sm:$0xff] %v876_v45  ;;  %v1231_v51 = vadd.f32 %v1230_v48, %v1229_v43  ;;  %898 = vst [vmem:[#allocation2 + $0x18] sm:$0xff] %v866_v46  ;;  %v1201_v52 = vadd.f32 %v1200_v50, %v1199_v44 }
 0x256   : > { %v1232_v53 = vpop.f32.mrf.mxu1  ;;  %v1202_v54 = vpop.f32.mrf.mxu0 }
 0x257   : > { %v877_v55 = vadd.f32 %v1231_v51, %v588_v47  ;;  %v867_v56 = vadd.f32 %v1201_v52, %v578_v49  ;;  %v595_v47 = vld [vmem:[#allocation2 + $0x90] sm:$0xff] }
 0x258   : > { %v1233_v58 = vpop.f32.mrf.mxu1  ;;  %v1203_v60 = vpop.f32.mrf.mxu0  ;;  %v596_v52 = vld [vmem:[#allocation2 + $0x70] sm:$0xff] }
 0x259   : > { %909 = vst [vmem:[#allocation2 + $0x8] sm:$0xff] %v877_v55  ;;  %v1234_v61 = vadd.f32 %v1233_v58, %v1232_v53  ;;  %899 = vst [vmem:[#allocation2 + $0x50] sm:$0xff] %v867_v56  ;;  %v1204_v62 = vadd.f32 %v1203_v60, %v1202_v54 }
 0x25a   : > { %v1235_v63 = vpop.f32.mrf.mxu1  ;;  %v1205_v0 = vpop.f32.mrf.mxu0 }
 0x25b   : > { %v878_v1 = vadd.f32 %v1234_v61, %v589_v57  ;;  %v868_v2 = vadd.f32 %v1204_v62, %v579_v59  ;;  %v597_v57 = vld [vmem:[#allocation2 + $0xc0] sm:$0xff]  ;;  %v598_v62 = vld [vmem:[#allocation2 + $0xa8] sm:$0xff] }
 0x25c   : > { %v1236_v4 = vpop.f32.mrf.mxu1  ;;  %v1206_v6 = vpop.f32.mrf.mxu0 }
 0x25d   : > { %910 = vst [vmem:[#allocation2 + $0x78] sm:$0xff] %v878_v1  ;;  %v1237_v7 = vadd.f32 %v1236_v4, %v1235_v63  ;;  %900 = vst [vmem:[#allocation2 + $0x68] sm:$0xff] %v868_v2  ;;  %v1207_v8 = vadd.f32 %v1206_v6, %v1205_v0 }
 0x25e   : > { %v1238_v9 = vpop.f32.mrf.mxu1  ;;  %v1208_v10 = vpop.f32.mrf.mxu0 }
 0x25f   : > { %v879_v11 = vadd.f32 %v1237_v7, %v590_v3  ;;  %v869_v12 = vadd.f32 %v1207_v8, %v580_v5  ;;  %v599_v3 = vld [vmem:[#allocation2 + $0xd0] sm:$0xff] }
 0x260   : > { %v1239_v14 = vpop.f32.mrf.mxu1  ;;  %v1209_v16 = vpop.f32.mrf.mxu0  ;;  %v600_v8 = vld [vmem:[#allocation2 + $0x10] sm:$0xff] }
 0x261   : > { %911 = vst [vmem:[#allocation2 + $0x38] sm:$0xff] %v879_v11  ;;  %v1240_v17 = vadd.f32 %v1239_v14, %v1238_v9  ;;  %901 = vst [vmem:[#allocation2 + $0x30] sm:$0xff] %v869_v12  ;;  %v1210_v18 = vadd.f32 %v1209_v16, %v1208_v10 }
 0x262   : > { %v1241_v19 = vpop.f32.mrf.mxu1  ;;  %v1211_v20 = vpop.f32.mrf.mxu0 }
 0x263   : > { %v880_v21 = vadd.f32 %v1240_v17, %v591_v13  ;;  %v870_v22 = vadd.f32 %v1210_v18, %v581_v15  ;;  %v601_v13 = vld [vmem:[#allocation2 + $0x28] sm:$0xff]  ;;  %v602_v18 = vld [vmem:[#allocation2 + $0xa0] sm:$0xff] }
 0x264   : > { %v1242_v24 = vpop.f32.mrf.mxu1  ;;  %v1212_v26 = vpop.f32.mrf.mxu0 }
 0x265   : > { %912 = vst [vmem:[#allocation2 + $0x58] sm:$0xff] %v880_v21  ;;  %v1243_v27 = vadd.f32 %v1242_v24, %v1241_v19  ;;  %902 = vst [vmem:[#allocation2 + $0x48] sm:$0xff] %v870_v22  ;;  %v1213_v28 = vadd.f32 %v1212_v26, %v1211_v20 }
 0x266   : > { %v1244_v29 = vpop.f32.mrf.mxu1  ;;  %v1214_v30 = vpop.f32.mrf.mxu0 }
 0x267   : > { %v881_v31 = vadd.f32 %v1243_v27, %v592_v23  ;;  %v871_v32 = vadd.f32 %v1213_v28, %v582_v25  ;;  %v603_v23 = vld [vmem:[#allocation2 + $0xf8] sm:$0xff]  ;;  %v604_v28 = vld [vmem:[#allocation2 + $0x20] sm:$0xff] }
 0x268   : > { %v1245_v34 = vpop.f32.mrf.mxu1  ;;  %v1215_v36 = vpop.f32.mrf.mxu0 }
 0x269   : > { %913 = vst [vmem:[#allocation2 + $0x40] sm:$0xff] %v881_v31  ;;  %v1246_v37 = vadd.f32 %v1245_v34, %v1244_v29  ;;  %903 = vst [vmem:[#allocation2 + $0x80] sm:$0xff] %v871_v32  ;;  %v1216_v38 = vadd.f32 %v1215_v36, %v1214_v30 }
 0x26a   : > { %v1247_v39 = vpop.f32.mrf.mxu1 }
 0x26b   : > { %v882_v40 = vadd.f32 %v1246_v37, %v593_v33  ;;  %v872_v41 = vadd.f32 %v1216_v38, %v583_v35  ;;  %v605_v33 = vld [vmem:[#allocation2 + $0x98] sm:$0xff] }
 0x26c   : > { %v1248_v43 = vpop.f32.mrf.mxu1 }
 0x26d   : > { %914 = vst [vmem:[#allocation2 + $0xc8] sm:$0xff] %v882_v40  ;;  %v1249_v44 = vadd.f32 %v1248_v43, %v1247_v39  ;;  %904 = vst [vmem:[#allocation2 + $0x88] sm:$0xff] %v872_v41 }
 0x26e   : > { %v1250_v45 = vpop.f32.mrf.mxu1 }
 0x26f   : > { %v883_v46 = vadd.f32 %v1249_v44, %v594_v42 }
 0x270   : > { %v1251_v48 = vpop.f32.mrf.mxu1 }
 0x271   : > { %915 = vst [vmem:[#allocation2 + $0xe0] sm:$0xff] %v883_v46  ;;  %v1252_v49 = vadd.f32 %v1251_v48, %v1250_v45 }
 0x272   : > { %v1253_v50 = vpop.f32.mrf.mxu1 }
 0x273   : > { %v884_v51 = vadd.f32 %v1252_v49, %v595_v47 }
 0x274   : > { %v1254_v53 = vpop.f32.mrf.mxu1 }
 0x275   : > { %916 = vst [vmem:[#allocation2 + $0x90] sm:$0xff] %v884_v51  ;;  %v1255_v54 = vadd.f32 %v1254_v53, %v1253_v50 }
 0x276   : > { %v1256_v55 = vpop.f32.mrf.mxu1 }
 0x277   : > { %v885_v56 = vadd.f32 %v1255_v54, %v596_v52 }
 0x278   : > { %v1257_v58 = vpop.f32.mrf.mxu1 }
 0x279   : > { %917 = vst [vmem:[#allocation2 + $0x70] sm:$0xff] %v885_v56  ;;  %v1258_v59 = vadd.f32 %v1257_v58, %v1256_v55 }
 0x27a   : > { %v1259_v60 = vpop.f32.mrf.mxu1 }
 0x27b   : > { %v886_v61 = vadd.f32 %v1258_v59, %v597_v57 }
 0x27c   : > { %v1260_v63 = vpop.f32.mrf.mxu1 }
 0x27d   : > { %918 = vst [vmem:[#allocation2 + $0xc0] sm:$0xff] %v886_v61  ;;  %v1261_v0 = vadd.f32 %v1260_v63, %v1259_v60 }
 0x27e   : > { %v1262_v1 = vpop.f32.mrf.mxu1 }
 0x27f   : > { %v887_v2 = vadd.f32 %v1261_v0, %v598_v62 }
 0x280   : > { %v1263_v4 = vpop.f32.mrf.mxu1 }
 0x281   : > { %919 = vst [vmem:[#allocation2 + $0xa8] sm:$0xff] %v887_v2  ;;  %v1264_v5 = vadd.f32 %v1263_v4, %v1262_v1 }
 0x282   : > { %v1265_v6 = vpop.f32.mrf.mxu1 }
 0x283   : > { %v888_v7 = vadd.f32 %v1264_v5, %v599_v3 }
 0x284   : > { %v1266_v9 = vpop.f32.mrf.mxu1 }
 0x285   : > { %920 = vst [vmem:[#allocation2 + $0xd0] sm:$0xff] %v888_v7  ;;  %v1267_v10 = vadd.f32 %v1266_v9, %v1265_v6 }
 0x286   : > { %v1268_v11 = vpop.f32.mrf.mxu1 }
 0x287   : > { %v889_v12 = vadd.f32 %v1267_v10, %v600_v8 }
 0x288   : > { %v1269_v14 = vpop.f32.mrf.mxu1 }
 0x289   : > { %921 = vst [vmem:[#allocation2 + $0x10] sm:$0xff] %v889_v12  ;;  %v1270_v15 = vadd.f32 %v1269_v14, %v1268_v11 }
 0x28a   : > { %v1271_v16 = vpop.f32.mrf.mxu1 }
 0x28b   : > { %v890_v17 = vadd.f32 %v1270_v15, %v601_v13 }
 0x28c   : > { %v1272_v19 = vpop.f32.mrf.mxu1 }
 0x28d   : > { %922 = vst [vmem:[#allocation2 + $0x28] sm:$0xff] %v890_v17  ;;  %v1273_v20 = vadd.f32 %v1272_v19, %v1271_v16 }
 0x28e   : > { %v1274_v21 = vpop.f32.mrf.mxu1 }
 0x28f   : > { %v891_v22 = vadd.f32 %v1273_v20, %v602_v18 }
 0x290   : > { %v1275_v24 = vpop.f32.mrf.mxu1 }
 0x291   : > { %923 = vst [vmem:[#allocation2 + $0xa0] sm:$0xff] %v891_v22  ;;  %v1276_v25 = vadd.f32 %v1275_v24, %v1274_v21 }
 0x292   : > { %v1277_v26 = vpop.f32.mrf.mxu1 }
 0x293   : > { %v892_v27 = vadd.f32 %v1276_v25, %v603_v23 }
 0x294   : > { %v1278_v29 = vpop.f32.mrf.mxu1 }
 0x295   : > { %924 = vst [vmem:[#allocation2 + $0xf8] sm:$0xff] %v892_v27  ;;  %v1279_v30 = vadd.f32 %v1278_v29, %v1277_v26 }
 0x296   : > { %v1280_v31 = vpop.f32.mrf.mxu1 }
 0x297   : > { %v893_v32 = vadd.f32 %v1279_v30, %v604_v28 }
 0x298   : > { %v1281_v34 = vpop.f32.mrf.mxu1 }
 0x299   : > { %925 = vst [vmem:[#allocation2 + $0x20] sm:$0xff] %v893_v32  ;;  %v1282_v35 = vadd.f32 %v1281_v34, %v1280_v31  ;;  %930 = sbr.rel (%p1143_p7) target bundleno = 687 (0x2af), region = 44 }
 0x29b   : > { %v894_v36 = vadd.f32 %v1282_v35, %v605_v33 }
 0x29d   : > { %926 = vst [vmem:[#allocation2 + $0x98] sm:$0xff] %v894_v36 }
 0x29e   : > { %v931_v37 = vld [vmem:[#allocation2 + $0xb0] sm:$0xff]  ;;  %v932_v38 = vld [vmem:[#allocation2] sm:$0xff]  ;;  %v933_v39 = vld [vmem:[#allocation2 + $0xd8] sm:$0xff] }
 0x29f   : > { %963 = vst [vmem:[%s1764_s29] sm:$0xff] %v931_v37  ;;  %964 = vst [vmem:[%s1764_s29 + $0x8] sm:$0xff] %v932_v38  ;;  %v934_v40 = vld [vmem:[#allocation2 + $0x18] sm:$0xff]  ;;  %v935_v41 = vld [vmem:[#allocation2 + $0x50] sm:$0xff] }
 0x2a0   : > { %965 = vst [vmem:[%s1764_s29 + $0x10] sm:$0xff] %v933_v39  ;;  %v936_v42 = vld [vmem:[#allocation2 + $0x68] sm:$0xff]  ;;  %966 = vst [vmem:[%s1764_s29 + $0x18] sm:$0xff] %v934_v40  ;;  %v937_v43 = vld [vmem:[#allocation2 + $0x30] sm:$0xff] }
 0x2a1   : > { %967 = vst [vmem:[%s1764_s29 + $0x20] sm:$0xff] %v935_v41  ;;  %968 = vst [vmem:[%s1764_s29 + $0x28] sm:$0xff] %v936_v42  ;;  %v938_v44 = vld [vmem:[#allocation2 + $0x48] sm:$0xff]  ;;  %v939_v45 = vld [vmem:[#allocation2 + $0x80] sm:$0xff] }
 0x2a2   : > { %969 = vst [vmem:[%s1764_s29 + $0x30] sm:$0xff] %v937_v43  ;;  %970 = vst [vmem:[%s1764_s29 + $0x38] sm:$0xff] %v938_v44  ;;  %v940_v46 = vld [vmem:[#allocation2 + $0x88] sm:$0xff]  ;;  %v942_v48 = vld [vmem:[#allocation2 + $0xb8] sm:$0xff] }
 0x2a3   : > { %971 = vst [vmem:[%s1764_s29 + $0x40] sm:$0xff] %v939_v45  ;;  %v941_v47 = vld [vmem:[#allocation2 + $0xe8] sm:$0xff]  ;;  %972 = vst [vmem:[%s1764_s29 + $0x48] sm:$0xff] %v940_v46  ;;  %v943_v49 = vld [vmem:[#allocation2 + $0x60] sm:$0xff] }
 0x2a4   : > { %973 = vst [vmem:[%s1764_s29 + $0x50] sm:$0xff] %v941_v47  ;;  %974 = vst [vmem:[%s1764_s29 + $0x58] sm:$0xff] %v942_v48  ;;  %v944_v50 = vld [vmem:[#allocation2 + $0xf0] sm:$0xff]  ;;  %v945_v51 = vld [vmem:[#allocation2 + $0x8] sm:$0xff] }
 0x2a5   : > { %975 = vst [vmem:[%s1764_s29 + $0x60] sm:$0xff] %v943_v49  ;;  %976 = vst [vmem:[%s1764_s29 + $0x68] sm:$0xff] %v944_v50  ;;  %v946_v52 = vld [vmem:[#allocation2 + $0x78] sm:$0xff]  ;;  %v949_v55 = vld [vmem:[#allocation2 + $0x40] sm:$0xff] }
 0x2a6   : > { %977 = vst [vmem:[%s1764_s29 + $0x70] sm:$0xff] %v945_v51  ;;  %v947_v53 = vld [vmem:[#allocation2 + $0x38] sm:$0xff]  ;;  %978 = vst [vmem:[%s1764_s29 + $0x78] sm:$0xff] %v946_v52  ;;  %v950_v56 = vld [vmem:[#allocation2 + $0xc8] sm:$0xff] }
 0x2a7   : > { %v948_v54 = vld [vmem:[#allocation2 + $0x58] sm:$0xff]  ;;  %979 = vst [vmem:[%s1764_s29 + $0x80] sm:$0xff] %v947_v53  ;;  %v951_v57 = vld [vmem:[#allocation2 + $0xe0] sm:$0xff]  ;;  %981 = vst [vmem:[%s1764_s29 + $0x90] sm:$0xff] %v949_v55 }
 0x2a8   : > { %980 = vst [vmem:[%s1764_s29 + $0x88] sm:$0xff] %v948_v54  ;;  %982 = vst [vmem:[%s1764_s29 + $0x98] sm:$0xff] %v950_v56  ;;  %v952_v58 = vld [vmem:[#allocation2 + $0x90] sm:$0xff]  ;;  %v954_v60 = vld [vmem:[#allocation2 + $0xc0] sm:$0xff] }
 0x2a9   : > { %983 = vst [vmem:[%s1764_s29 + $0xa0] sm:$0xff] %v951_v57  ;;  %v953_v59 = vld [vmem:[#allocation2 + $0x70] sm:$0xff]  ;;  %984 = vst [vmem:[%s1764_s29 + $0xa8] sm:$0xff] %v952_v58  ;;  %v955_v61 = vld [vmem:[#allocation2 + $0xa8] sm:$0xff] }
 0x2aa   : > { %985 = vst [vmem:[%s1764_s29 + $0xb0] sm:$0xff] %v953_v59  ;;  %986 = vst [vmem:[%s1764_s29 + $0xb8] sm:$0xff] %v954_v60  ;;  %v956_v62 = vld [vmem:[#allocation2 + $0xd0] sm:$0xff]  ;;  %v958_v0 = vld [vmem:[#allocation2 + $0x28] sm:$0xff] }
 0x2ab   : > { %v957_v63 = vld [vmem:[#allocation2 + $0x10] sm:$0xff]  ;;  %987 = vst [vmem:[%s1764_s29 + $0xc0] sm:$0xff] %v955_v61  ;;  %988 = vst [vmem:[%s1764_s29 + $0xc8] sm:$0xff] %v956_v62  ;;  %v959_v1 = vld [vmem:[#allocation2 + $0xa0] sm:$0xff] }
 0x2ac   : > { %989 = vst [vmem:[%s1764_s29 + $0xd0] sm:$0xff] %v957_v63  ;;  %v960_v2 = vld [vmem:[#allocation2 + $0xf8] sm:$0xff]  ;;  %990 = vst [vmem:[%s1764_s29 + $0xd8] sm:$0xff] %v958_v0  ;;  %v961_v3 = vld [vmem:[#allocation2 + $0x20] sm:$0xff] }
 0x2ad   : > { %991 = vst [vmem:[%s1764_s29 + $0xe0] sm:$0xff] %v959_v1  ;;  %992 = vst [vmem:[%s1764_s29 + $0xe8] sm:$0xff] %v960_v2  ;;  %v962_v4 = vld [vmem:[#allocation2 + $0x98] sm:$0xff] }
 0x2ae   : > { %993 = vst [vmem:[%s1764_s29 + $0xf0] sm:$0xff] %v961_v3  ;;  %994 = vst [vmem:[%s1764_s29 + $0xf8] sm:$0xff] %v962_v4 }
 0x2af PF: > { %s1150_s18 = sshll.u32 %s1587_s19, 12  ;;  %s1009_s24 = sshll.u32 %s1764_s29, 4  ;;  %s1939_s24 = int_to_ptr.vmem [resolvable:$true] %s1009_s24 }
 0x2b0   : > { %s1936_s27 = scalar_lea.hbm %s2006_s3, %s1150_s18  ;;  %s1943_s15 = scalar_lea.sflag [#allocation5], %s219_s17 }
 0x2b1   : > { %s1479_s26 = scalar_lea.vmem %s1939_s24, 4096  ;;  %s1606_s19 = smov [#allocation6]  }
 0x2b2   : > { %p1480_p8 = scmp.ne.s32.totalorder %s1939_s24, %s1479_s26  ;;  %s1483_s4 = sshll.u32 %s1606_s19, 4  ;;  %s1484_s4 = int_to_ptr.vmem [resolvable:$false] %s1483_s4 }
 0x2b3   : > { %s1485_s25 = scalar_lea.vmem %s1484_s4, 8192  ;;  %p1486_p3 = scmp.lt.s32.totalorder %s1939_s24, %s1484_s4 }
 0x2b4   : > { %p1481_p9 = pnand %p1480_p8, %p1711_p12  ;;  %p1487_p11 = scmp.lt.s32.totalorder %s1485_s25, %s1479_s26 }
 0x2b6   : > { %p1482_p10 = pneg %p1481_p9  ;;  %p1488_p13 = por %p1487_p11, %p1486_p3 }
 0x2b8   : > { %p1489_p0 = pnand %p1488_p13, %p1482_p10 }
 0x2ba   : > { %1492 = shalt.err (!%p1489_p0)
}
 0x2bb   : > { %s1493_s17 = scalar_lea.hbm %s1936_s27, 4096  ;;  %s1497_s23 = scalar_lea.hbm %s2006_s3, 8192 }
 0x2bc   : > { %p1494_p1 = scmp.ne.s32.totalorder %s1936_s27, %s1493_s17  ;;  %p1498_p5 = scmp.lt.s32.totalorder %s1936_s27, %s2006_s3 }
 0x2bd   : > { %p1499_p7 = scmp.lt.s32.totalorder %s1497_s23, %s1493_s17 }
 0x2be   : > { %p1495_p6 = pnand %p1494_p1, %p1711_p12 }
 0x2bf   : > { %p1500_p8 = por %p1499_p7, %p1498_p5 }
 0x2c0   : > { %p1496_p4 = pneg %p1495_p6 }
 0x2c2   : > { %p1501_p9 = pnand %p1500_p8, %p1496_p4 }
 0x2c4   : > { %1504 = shalt.err (!%p1501_p9)
}
 0x2c5   : > { %s1607_s21 = smov 128   ;;  %s1608_s9 = smov 8  }
 0x2c6   : > { %1341 = dma.vmem_to_hbm [thread:$0]  (%p1711_p12), %s1939_s24, 4096, %s1936_s27, %s1943_s15, %s1607_s21, %s1607_s21, %s1608_s9  }
 0x2c7 PF: > { %p1352_p10 = scmp.ge.s32.totalorder %s1599_s22, 2  ;;  %s1024_s18 = sand.u32 1, %s1559_s12  }
 0x2c8   : > { %s1025_s30 = scalar_lea.sflag [#allocation5], %s1024_s18 }
 0x2c9   : > { %p1348_p3 = pnand %p1352_p10, %p1724_p2 }
 0x2cb   : > { %p1349_p11 = pneg %p1348_p3 }
 0x2cd   : > { %1554 = dma.done.wait (%p1349_p11), %s1025_s30, 4096  }
 0x2ce   : > { %1556 = vsyncadd (%p1349_p11), %s1025_s30, 4294963200  ;;  %s19_s22 = sadd.s32 1, %s1599_s22   ;;  %s2021_s7 = sld [smem:[#allocation9_spill]] }
 0x2cf   : > { %p16_p13 = scmp.ge.s32.totalorder %s19_s22, 6   ;;  %s2022_s17 = sld [smem:[#allocation13_spill]] }
 0x2d0   : > { %s2023_s19 = sld [smem:[#allocation10_spill]]  ;;  %s2026_s12 = smov %s1563_s13 }
 0x2d1   : > { %s2024_s6 = sld [smem:[#allocation11_spill]]  ;;  %s2027_s13 = smov %s1567_s14 }
 0x2d2   : > { %s2025_s21 = sld [smem:[#allocation12_spill]]  ;;  %s2028_s14 = smov %s1716_s8 }
 0x2d3   : > { %s2029_s15 = smov %s1575_s16  ;;  %s2031_s18 = smov %s1591_s20 }
 0x2d4   : > { %s2030_s16 = smov %s2021_s7  ;;  %18 = sbr.rel (!%p16_p13) target bundleno = 9 (0x9), region = 88 }
 0x2d7   : > { %s2032_s20 = smov %s2024_s6 }
 0x2d9   :  { %1030 = vsyncpa [#allocation4], 1 }
 0x2da   :  { %1032 = vsyncpa [#allocation4 + $0x1], 1 }
 0x2db   :  { %1033 = vsyncpa [#allocation5], 1 }
 0x2dc   :  { %1035 = vsyncpa [#allocation5 + $0x1], 1 }

</bundles_post_ra>
